<compile_context>
chip_gen: v5e
topology: v5e:2x2
jax: 0.10.0
libtpu: 0.0.40
codegen_flags: <defaults>
</compile_context>

<pallas_src>
import numpy as np
import jax
import jax.numpy as jnp
from jax.experimental import pallas as pl
from jax.experimental.pallas import tpu as pltpu

_LANE = 128


def _gumbel_esque_kernel(x_ref, o_ref):
    B = x_ref.shape[0]
    z = x_ref[...].astype(jnp.float32)            # (B, S, 128)
    rows = [z[i] for i in range(B)]               # B x (S, 128) full-vreg tiles

    # --- descending rank index (0 = largest) with index tie-break ----------
    # NOTE: among equal values the SMALLER original index gets the smaller
    # (better) rank; the reference's reversed stable argsort breaks ties the
    # other way.  The permutahedron projection is symmetric in tied
    # coordinates, so the final soft ranks are identical — do not "fix" this.
    ranks = []
    for i in range(B):
        r = jnp.zeros(rows[0].shape, jnp.int32)
        for j in range(B):
            if j == i:
                continue
            beats = (rows[j] >= rows[i]) if j < i else (rows[j] > rows[i])
            r = r + beats.astype(jnp.int32)
        ranks.append(r)

    # --- values sorted descending: s[k] via one-hot select (B is tiny) -----
    s = []
    for k in range(B):
        sk = jnp.zeros_like(rows[0])
        for i in range(B):
            sk = jnp.where(ranks[i] == k, rows[i], sk)
        s.append(sk)

    # --- exact l2 isotonic (non-increasing) regression of y = s - w --------
    # w = (B, B-1, ..., 1);  v_i = min_{j<=i} max_{k>=i} mean(y[j..k])
    # O(B^2): for each j, h(j,i) = max(mean(y[j..i]), h(j,i+1)) scanning i
    # downward; v_i = running min over j<=i of h(j,i).
    y = [s[k] - float(B - k) for k in range(B)]
    v = [None] * B
    for j in range(B):
        # forward pass: means m(j,i) = mean(y[j..i]) for i = j..B-1
        means = []
        acc = jnp.zeros_like(y[0])
        for i in range(j, B):
            acc = acc + y[i]
            means.append(acc * (1.0 / float(i - j + 1)))
        # downward pass: h(j,i) and min-update of v_i
        h = None
        for i in range(B - 1, j - 1, -1):
            m = means[i - j]
            h = m if h is None else jnp.maximum(m, h)
            v[i] = h if v[i] is None else jnp.minimum(v[i], h)

    # --- unsort + Gumbel transform; single consolidated full-block store ---
    # primal[k] = s[k] - v[k]; for element i, s[rank_i] == rows[i], so
    # out_i = rows[i] - v[rank_i]  (no primal list -> fewer live vregs).
    inv_np1 = 1.0 / float(B + 1)
    out_rows = []
    for i in range(B):
        vi = jnp.zeros_like(rows[0])
        for k in range(B):
            vi = jnp.where(ranks[i] == k, v[k], vi)
        u = (rows[i] - vi) * inv_np1              # in (0, 1) by construction
        out_rows.append(-jnp.log(-jnp.log(u)))
    o_ref[...] = jnp.stack(out_rows, axis=0).astype(o_ref.dtype)


def gumbel_esque(x):
    """x: (B, H, W, C) float -> (B, H, W, C) float32."""
    B, H, W, C = x.shape
    P = H * W * C
    nS = -(-P // _LANE)                           # 128-lane chunks of positions

    # Block sizing: large lane-dense blocks, capped at ~1 MiB per block so
    # double-buffered in+out fits comfortably even in v5e's 16 MiB scoped VMEM
    # and keeps the unrolled per-B live set within the vreg budget.
    S_cap = 64
    while S_cap > 8 and B * S_cap * _LANE * 4 > (1 << 20):
        S_cap //= 2
    if nS <= S_cap:
        S = -(-nS // 8) * 8                       # single step, sublane-aligned
    else:
        S = S_cap
    nS_pad = -(-nS // S) * S
    P_pad = nS_pad * _LANE

    xf = x.reshape(B, P)
    if P_pad != P:
        # TODO(synk): ragged tail could be handled with a masked last block to
        # avoid this pad + slice HBM round-trip; padding is at most S*128-1
        # positions and all-zero padded columns stay finite through the kernel.
        xf = jnp.pad(xf, ((0, 0), (0, P_pad - P)))
    xf = xf.reshape(B, nS_pad, _LANE)

    out = pl.pallas_call(
        _gumbel_esque_kernel,
        out_shape=jax.ShapeDtypeStruct((B, nS_pad, _LANE), jnp.float32),
        grid=(nS_pad // S,),
        in_specs=[pl.BlockSpec((B, S, _LANE), lambda i: (0, i, 0))],
        out_specs=pl.BlockSpec((B, S, _LANE), lambda i: (0, i, 0)),
        compiler_params=pltpu.CompilerParams(
            dimension_semantics=("parallel",)),
    )(xf)

    out = out.reshape(B, P_pad)
    if P_pad != P:
        out = out[:, :P]
    return out.reshape(B, H, W, C)


# ---------------------------- numpy reference -------------------------------
def _reference(x):
    x = np.asarray(x, dtype=np.float64)
    B, H, W, C = x.shape
    flat = x.reshape(B, -1)
    out = np.empty_like(flat)
    w = np.arange(B, 0, -1).astype(np.float64)
    for p in range(flat.shape[1]):
        z = flat[:, p]
        perm = np.argsort(z, kind="stable")[::-1]
        s_sorted = z[perm]
        y = s_sorted - w
        # PAV for non-increasing isotonic regression
        blocks = []
        for val in y:
            blocks.append([val, 1.0])
            while (len(blocks) > 1 and
                   blocks[-2][0] / blocks[-2][1] < blocks[-1][0] / blocks[-1][1]):
                s2, c2 = blocks.pop()
                blocks[-1][0] += s2
                blocks[-1][1] += c2
        v = np.concatenate([np.full(int(c), sm / c) for sm, c in blocks])
        primal = s_sorted - v
        r = np.empty(B)
        r[perm] = primal
        out[:, p] = r
    u = out / (B + 1)
    return (-np.log(-np.log(u))).reshape(B, H, W, C)


if __name__ == "__main__":
    key = jax.random.PRNGKey(0)
    x = jax.random.normal(key, (2, 16, 16, 4), dtype=jnp.float32)

    y = gumbel_esque(x)
    y = jax.block_until_ready(y)

    ref = _reference(np.asarray(x))
    np.testing.assert_allclose(np.asarray(y), ref, rtol=2e-4, atol=2e-4)
    print("KERNEL_OK")
</pallas_src>

<mosaic_0001>
module attributes {stable_mosaic.version = 11 : i64} {
  func.func @_gumbel_esque_kernel(%arg0: i32, %arg1: memref<2x8x128xf32, #tpu.memory_space<vmem>>, %arg2: memref<2x8x128xf32, #tpu.memory_space<vmem>>) attributes {dimension_semantics = [#tpu.dimension_semantics<parallel>], iteration_bounds = array<i64: 1>, scalar_prefetch = 0 : i64, scratch_operands = 0 : i64, tpu.core_type = #tpu.core_type<tc>, window_params = [{transform_indices = @transform_0, window_bounds = array<i64: 2, 8, 128>}, {transform_indices = @transform_1, window_bounds = array<i64: 2, 8, 128>}]} {
    %c0 = arith.constant 0 : index
    %c0_0 = arith.constant 0 : index
    %c0_1 = arith.constant 0 : index
    %0 = vector.load %arg1[%c0, %c0_0, %c0_1] : memref<2x8x128xf32, #tpu.memory_space<vmem>>, vector<2x8x128xf32>
    %1 = vector.extract_strided_slice %0 {offsets = [0, 0, 0], sizes = [1, 8, 128], strides = [1, 1, 1]} : vector<2x8x128xf32> to vector<1x8x128xf32>
    %2 = vector.shape_cast %1 : vector<1x8x128xf32> to vector<8x128xf32>
    %3 = vector.extract_strided_slice %0 {offsets = [1, 0, 0], sizes = [1, 8, 128], strides = [1, 1, 1]} : vector<2x8x128xf32> to vector<1x8x128xf32>
    %4 = vector.shape_cast %3 : vector<1x8x128xf32> to vector<8x128xf32>
    %c0_i32 = arith.constant 0 : i32
    %5 = vector.broadcast %c0_i32 : i32 to vector<8x128xi32>
    %6 = arith.cmpf ogt, %4, %2 : vector<8x128xf32>
    %7 = arith.extui %6 : vector<8x128xi1> to vector<8x128xi32>
    %8 = arith.addi %5, %7 : vector<8x128xi32>
    %c0_i32_2 = arith.constant 0 : i32
    %9 = vector.broadcast %c0_i32_2 : i32 to vector<8x128xi32>
    %10 = arith.cmpf oge, %2, %4 : vector<8x128xf32>
    %11 = arith.extui %10 : vector<8x128xi1> to vector<8x128xi32>
    %12 = arith.addi %9, %11 : vector<8x128xi32>
    %cst = arith.constant 0.000000e+00 : f32
    %13 = vector.broadcast %cst : f32 to vector<8x128xf32>
    %c0_i32_3 = arith.constant 0 : i32
    %14 = vector.broadcast %c0_i32_3 : i32 to vector<8x128xi32>
    %15 = arith.cmpi eq, %8, %14 : vector<8x128xi32>
    %16 = arith.select %15, %2, %13 : vector<8x128xi1>, vector<8x128xf32>
    %c0_i32_4 = arith.constant 0 : i32
    %17 = vector.broadcast %c0_i32_4 : i32 to vector<8x128xi32>
    %18 = arith.cmpi eq, %12, %17 : vector<8x128xi32>
    %19 = arith.select %18, %4, %16 : vector<8x128xi1>, vector<8x128xf32>
    %cst_5 = arith.constant 0.000000e+00 : f32
    %20 = vector.broadcast %cst_5 : f32 to vector<8x128xf32>
    %c1_i32 = arith.constant 1 : i32
    %21 = vector.broadcast %c1_i32 : i32 to vector<8x128xi32>
    %22 = arith.cmpi eq, %8, %21 : vector<8x128xi32>
    %23 = arith.select %22, %2, %20 : vector<8x128xi1>, vector<8x128xf32>
    %c1_i32_6 = arith.constant 1 : i32
    %24 = vector.broadcast %c1_i32_6 : i32 to vector<8x128xi32>
    %25 = arith.cmpi eq, %12, %24 : vector<8x128xi32>
    %26 = arith.select %25, %4, %23 : vector<8x128xi1>, vector<8x128xf32>
    %cst_7 = arith.constant 2.000000e+00 : f32
    %27 = vector.broadcast %cst_7 : f32 to vector<8x128xf32>
    %28 = arith.subf %19, %27 : vector<8x128xf32>
    %cst_8 = arith.constant 1.000000e+00 : f32
    %29 = vector.broadcast %cst_8 : f32 to vector<8x128xf32>
    %30 = arith.subf %26, %29 : vector<8x128xf32>
    %cst_9 = arith.constant 0.000000e+00 : f32
    %31 = vector.broadcast %cst_9 : f32 to vector<8x128xf32>
    %32 = arith.addf %31, %28 : vector<8x128xf32>
    %cst_10 = arith.constant 1.000000e+00 : f32
    %33 = vector.broadcast %cst_10 : f32 to vector<8x128xf32>
    %34 = arith.mulf %32, %33 : vector<8x128xf32>
    %35 = arith.addf %32, %30 : vector<8x128xf32>
    %cst_11 = arith.constant 5.000000e-01 : f32
    %36 = vector.broadcast %cst_11 : f32 to vector<8x128xf32>
    %37 = arith.mulf %35, %36 : vector<8x128xf32>
    %38 = arith.maximumf %34, %37 : vector<8x128xf32>
    %cst_12 = arith.constant 0.000000e+00 : f32
    %39 = vector.broadcast %cst_12 : f32 to vector<8x128xf32>
    %40 = arith.addf %39, %30 : vector<8x128xf32>
    %cst_13 = arith.constant 1.000000e+00 : f32
    %41 = vector.broadcast %cst_13 : f32 to vector<8x128xf32>
    %42 = arith.mulf %40, %41 : vector<8x128xf32>
    %43 = arith.minimumf %37, %42 : vector<8x128xf32>
    %cst_14 = arith.constant 0.000000e+00 : f32
    %44 = vector.broadcast %cst_14 : f32 to vector<8x128xf32>
    %c0_i32_15 = arith.constant 0 : i32
    %45 = vector.broadcast %c0_i32_15 : i32 to vector<8x128xi32>
    %46 = arith.cmpi eq, %8, %45 : vector<8x128xi32>
    %47 = arith.select %46, %38, %44 : vector<8x128xi1>, vector<8x128xf32>
    %c1_i32_16 = arith.constant 1 : i32
    %48 = vector.broadcast %c1_i32_16 : i32 to vector<8x128xi32>
    %49 = arith.cmpi eq, %8, %48 : vector<8x128xi32>
    %50 = arith.select %49, %43, %47 : vector<8x128xi1>, vector<8x128xf32>
    %51 = arith.subf %2, %50 : vector<8x128xf32>
    %cst_17 = arith.constant 0.333333343 : f32
    %52 = vector.broadcast %cst_17 : f32 to vector<8x128xf32>
    %53 = arith.mulf %51, %52 : vector<8x128xf32>
    %54 = math.log %53 : vector<8x128xf32>
    %cst_18 = arith.constant 0.000000e+00 : f32
    %55 = vector.broadcast %cst_18 : f32 to vector<8x128xf32>
    %56 = arith.subf %55, %54 : vector<8x128xf32>
    %57 = math.log %56 : vector<8x128xf32>
    %cst_19 = arith.constant 0.000000e+00 : f32
    %58 = vector.broadcast %cst_19 : f32 to vector<8x128xf32>
    %59 = arith.subf %58, %57 : vector<8x128xf32>
    %cst_20 = arith.constant 0.000000e+00 : f32
    %60 = vector.broadcast %cst_20 : f32 to vector<8x128xf32>
    %c0_i32_21 = arith.constant 0 : i32
    %61 = vector.broadcast %c0_i32_21 : i32 to vector<8x128xi32>
    %62 = arith.cmpi eq, %12, %61 : vector<8x128xi32>
    %63 = arith.select %62, %38, %60 : vector<8x128xi1>, vector<8x128xf32>
    %c1_i32_22 = arith.constant 1 : i32
    %64 = vector.broadcast %c1_i32_22 : i32 to vector<8x128xi32>
    %65 = arith.cmpi eq, %12, %64 : vector<8x128xi32>
    %66 = arith.select %65, %43, %63 : vector<8x128xi1>, vector<8x128xf32>
    %67 = arith.subf %4, %66 : vector<8x128xf32>
    %cst_23 = arith.constant 0.333333343 : f32
    %68 = vector.broadcast %cst_23 : f32 to vector<8x128xf32>
    %69 = arith.mulf %67, %68 : vector<8x128xf32>
    %70 = math.log %69 : vector<8x128xf32>
    %cst_24 = arith.constant 0.000000e+00 : f32
    %71 = vector.broadcast %cst_24 : f32 to vector<8x128xf32>
    %72 = arith.subf %71, %70 : vector<8x128xf32>
    %73 = math.log %72 : vector<8x128xf32>
    %cst_25 = arith.constant 0.000000e+00 : f32
    %74 = vector.broadcast %cst_25 : f32 to vector<8x128xf32>
    %75 = arith.subf %74, %73 : vector<8x128xf32>
    %76 = vector.shape_cast %59 : vector<8x128xf32> to vector<1x8x128xf32>
    %77 = vector.shape_cast %75 : vector<8x128xf32> to vector<1x8x128xf32>
    %78 = tpu.concatenate %76, %77 in 0 : vector<1x8x128xf32>, vector<1x8x128xf32> -> vector<2x8x128xf32>
    %c0_26 = arith.constant 0 : index
    %c0_27 = arith.constant 0 : index
    %c0_28 = arith.constant 0 : index
    %79 = vector.load %arg2[%c0_26, %c0_27, %c0_28] : memref<2x8x128xf32, #tpu.memory_space<vmem>>, vector<2x8x128xf32>
    tpu.vector_store %arg2[%c0_26, %c0_27, %c0_28], %78 {strides = array<i32>} : memref<2x8x128xf32, #tpu.memory_space<vmem>>, vector<2x8x128xf32>,
    return
  }
  func.func @transform_0(%arg0: i32) -> (i32, i32, i32) {
    %c0_i32 = arith.constant 0 : i32
    %c0_i32_0 = arith.constant 0 : i32
    %c0_i32_1 = arith.constant 0 : i32
    return %c0_i32, %arg0, %c0_i32_0 : i32, i32, i32
  }
  func.func @transform_1(%arg0: i32) -> (i32, i32, i32) {
    %c0_i32 = arith.constant 0 : i32
    %c0_i32_0 = arith.constant 0 : i32
    %c0_i32_1 = arith.constant 0 : i32
    return %c0_i32, %arg0, %c0_i32_0 : i32, i32, i32
  }
}

</mosaic_0001>

<bundles_post_ra>
// kernel: tpu_custom_call.1
= control target key start
LH: loop header
LB: loop body
LE: loop exit
PB: predicated region body
PF: predicated region fallthrough
CT: control target
= control target key end

     0   :  { %6 = vsyncpa [#allocation3], 0  ;;  %s188_s0 = inlined_call_operand.hbm [shape: f32[2,8,128], index: 0, kind: input, shape index: {}]   ;;  %s189_s1 = inlined_call_operand.hbm [shape: f32[2,8,128], index: 1, kind: output, shape index: {}]  }
   0x1   :  { %7 = vsyncpa [#allocation4], 0  ;;  %s12_s8 = sshll.u32 %s188_s0, 4  ;;  %s156_s9 = smov [#allocation2]   ;;  %s13_s8 = int_to_ptr.hbm [resolvable:$true] %s12_s8 }
   0x2   :  { %s14_s10 = sshll.u32 %s156_s9, 4  ;;  %s157_s11 = smov 128   ;;  %s15_s10 = int_to_ptr.vmem [resolvable:$true] %s14_s10 }
   0x3   :  { %s158_s12 = smov 8  }
   0x4   :  { %20 = dma.hbm_to_vmem [thread:$0]  %s13_s8, 256, %s15_s10, [#allocation3], %s157_s11, %s157_s11, %s158_s12  }
   0x5   :  { %152 = dma.done.wait [#allocation3], 256  }
   0x6   :  { %153 = vsyncadd [#allocation3], 4294967040  ;;  %v25_v0 = vld [vmem:[#allocation2] sm:$0xff]  ;;  %v26_v1 = vld [vmem:[#allocation2 + $0x8] sm:$0xff]  ;;  %s159_s0 = smov [#allocation5]   ;;  %s75_s16 = sshll.u32 %s189_s1, 4  ;;  %s76_s16 = int_to_ptr.hbm [resolvable:$true] %s75_s16 }
   0x7   :  { %vm27_vm0 = vcmp.gt.f32.partialorder %v26_v1, %v25_v0  ;;  %vm29_vm1 = vcmp.ge.f32.partialorder %v25_v0, %v26_v1  ;;  %s73_s13 = sshll.u32 %s159_s0, 4  ;;  %s74_s13 = int_to_ptr.vmem [resolvable:$true] %s73_s13 }
   0x8   :  { %vm88_vm2 = vmneg %vm27_vm0  ;;  %v36_v2 = vsel %vm27_vm0, %v25_v0, 0.0 }
   0x9   :  { %v32_v3 = vsel %vm88_vm2, %v25_v0, 0.0  ;;  %vm89_vm3 = vmneg %vm29_vm1  ;;  %v38_v4 = vsel %vm29_vm1, %v26_v1, %v36_v2 }
   0xa   :  { %v34_v5 = vsel %vm89_vm3, %v26_v1, %v32_v3  ;;  %v91_v6 = vadd.f32 -1.0, %v38_v4 }
   0xb   :  { %v90_v7 = vadd.f32 -2.0, %v34_v5 }
   0xd   :  { %v42_v8 = vadd.f32 %v91_v6, %v90_v7 }
   0xf   :  { %v43_v9 = vmul.f32 0.5, %v42_v8 }
  0x11   :  { %v44_v10 = vmax.f32 %v90_v7, %v43_v9  ;;  %v46_v11 = vmin.f32 %v43_v9, %v91_v6 }
  0x13   :  { %v47_v12 = vsel %vm88_vm2, %v44_v10, 0.0  ;;  %v57_v13 = vsel %vm89_vm3, %v44_v10, 0.0 }
  0x14   :  { %v48_v14 = vsel %vm27_vm0, %v46_v11, %v47_v12  ;;  %v58_v15 = vsel %vm29_vm1, %v46_v11, %v57_v13 }
  0x15   :  { %v49_v16 = vsub.f32 %v25_v0, %v48_v14  ;;  %v59_v17 = vsub.f32 %v26_v1, %v58_v15 }
  0x17   :  { %v50_v18 = vmul.f32 0.33333334, %v49_v16  ;;  %v60_v19 = vmul.f32 0.33333334, %v59_v17 }
  0x19   :  { %96 = vlog2.f32 %v50_v18 }
  0x1a   :  { %98 = vlog2.f32 %v60_v19 }
  0x1f   :  { %v97_v20 = vpop.eup %96 }
  0x20   :  { %v99_v21 = vpop.eup %98  ;;  %v52_v22 = vmul.f32 0.6931472, %v97_v20 }
  0x21   :  { %v62_v23 = vmul.f32 0.6931472, %v99_v21 }
  0x22   :  { %v53_v24 = vsub.f32 0.0, %v52_v22 }
  0x23   :  { %v63_v25 = vsub.f32 0.0, %v62_v23 }
  0x24   :  { %100 = vlog2.f32 %v53_v24 }
  0x25   :  { %102 = vlog2.f32 %v63_v25 }
  0x2a   :  { %v101_v26 = vpop.eup %100 }
  0x2b   :  { %v103_v27 = vpop.eup %102  ;;  %v55_v28 = vmul.f32 0.6931472, %v101_v26 }
  0x2c   :  { %v65_v29 = vmul.f32 0.6931472, %v103_v27 }
  0x2d   :  { %v56_v30 = vsub.f32 0.0, %v55_v28 }
  0x2e   :  { %v66_v31 = vsub.f32 0.0, %v65_v29 }
  0x2f   :  { %67 = vst [vmem:[#allocation5] sm:$0xff] %v56_v30 }
  0x30   :  { %68 = vst [vmem:[#allocation5 + $0x8] sm:$0xff] %v66_v31 }
  0x31   :  { %81 = dma.vmem_to_hbm [thread:$0]  %s74_s13, 256, %s76_s16, [#allocation4], %s157_s11, %s157_s11, %s158_s12  }
  0x32   :  { %154 = dma.done.wait [#allocation4], 256  }
  0x33   :  { %155 = vsyncadd [#allocation4], 4294967040 }
  0x34   :  { %86 = vsyncpa [#allocation3], 1 }
  0x35   :  { %87 = vsyncpa [#allocation4], 1 }

</bundles_post_ra>
